<compile_context>
chip_gen: v6e
topology: v6e:2x2x1
jax: 0.10.0
libtpu: 0.0.40
codegen_flags: <defaults>
</compile_context>

<pallas_src>
import numpy as np
import jax
import jax.numpy as jnp
from jax.experimental import pallas as pl
from jax.experimental.pallas import tpu as pltpu


def _round_up(a, b):
    return (a + b - 1) // b * b


def cve_kernel(x_ref, w1_ref, b1_ref, w2_ref, o_ref):
    # x_ref : (pack, R)           parity-split scalar inputs, lane-dense along R
    # w1_ref: (pack*D1, 1)        W1^T tiled `pack` times along sublanes
    # b1_ref: (pack*D1, 1)        b1 tiled the same way
    # w2_ref: (pack*D1, pack*H)   block-diag(W2): matmul lands in packed layout
    # o_ref : (R, pack*H)         lane-dense output tile (bytes == row-major (pack*R, H))
    pack = x_ref.shape[0]
    d1 = w1_ref.shape[0] // pack
    r = x_ref.shape[1]

    xb = x_ref[...]                                       # (pack, R)
    # Sublane-expand: each input row replicated D1 times -> (pack*D1, R), dense.
    xrep = jnp.concatenate(
        [jnp.broadcast_to(xb[p:p + 1, :], (d1, r)) for p in range(pack)], axis=0)
    # Dense EUP tanh: exactly N*D1 useful lanes, no vreg padding.
    t = jnp.tanh(xrep * w1_ref[...] + b1_ref[...])        # (pack*D1, R)
    # Small XLU transpose (only pack*D1 rows), then the MXU matmul produces the
    # result directly in the packed (R, 128) store orientation.
    z = jnp.dot(t.T, w2_ref[...], preferred_element_type=jnp.float32)  # (R, pack*H)
    o_ref[...] = z.astype(o_ref.dtype)


def cve_forward(x, W1, b1, W2, *, tile_n=16384, out_dtype=None):
    """x: (..., ) any shape -> (..., H).

    tile_n: flattened elements processed per grid step.  Sweep 8192-32768; large
    tiles amortize the ~0.35 us per-step cost (f32 output tile at tile_n=16384 is
    only 4 MiB, trivially within even v7x's 64 MiB VMEM with the explicit
    vmem_limit set below).  out_dtype=jnp.bfloat16 halves HBM writeback when the
    consumer tolerates it.
    """
    orig_shape = x.shape
    D1 = W1.shape[1]
    H = W2.shape[1]
    N = int(np.prod(orig_shape))
    out_dtype = out_dtype if out_dtype is not None else x.dtype
    f32 = jnp.float32

    # Lane-packing factor: pack consecutive output rows so the stored last dim is
    # a full 128-lane group when H < 128 and divides 128 evenly (H=64 -> pack=2).
    pack = 128 // H if (H < 128 and 128 % H == 0) else 1
    # Input block is (pack, tile_n/pack): lane dim must be a multiple of 128.
    # This also makes the output block's sublane dim a multiple of 128, so both
    # the f32 (8,128) and bf16 (16,128) minimum tiles are satisfied automatically.
    align = 128 * pack
    tile_n = max(align, min(_round_up(tile_n, align), _round_up(N, align)))
    N_pad = _round_up(N, tile_n)
    R_tile = tile_n // pack
    R_total = N_pad // pack
    out_cols = H * pack

    x_flat = x.reshape(N).astype(f32)
    if N_pad != N:
        x_flat = jnp.concatenate([x_flat, jnp.zeros((N_pad - N,), f32)])
    # Parity-split so the flattened-N axis lives on lanes inside the kernel.
    # Tiny XLA op: input is ~1/H of the output bytes.
    x_split = x_flat.reshape(R_total, pack).T                       # (pack, R_total)

    w1big = jnp.tile(W1.reshape(D1, 1).astype(f32), (pack, 1))      # (pack*D1, 1)
    b1big = jnp.tile(b1.reshape(D1, 1).astype(f32), (pack, 1))      # (pack*D1, 1)
    w2big = jnp.kron(jnp.eye(pack, dtype=f32), W2.astype(f32))      # (pack*D1, pack*H)

    itemsize = jnp.dtype(out_dtype).itemsize
    out_block_bytes = R_tile * out_cols * itemsize
    # Explicit scoped-VMEM budget: double-buffered output + in-kernel temporaries.
    # Kept <= 56 MiB so it is valid on v7x (64 MiB physical) and above the 16/32 MiB
    # default scoped limits on v5e/v6e for multi-MiB tiles.
    vmem_limit = int(min(56 << 20, max(32 << 20, 6 * out_block_bytes + (8 << 20))))

    cost = pl.CostEstimate(
        flops=2 * N_pad * D1 * H * pack + 2 * N_pad * D1,
        transcendentals=N_pad * D1,
        bytes_accessed=4 * N_pad + itemsize * N_pad * H
        + 4 * pack * D1 * (2 + pack * H),
    )

    out_flat = pl.pallas_call(
        cve_kernel,
        out_shape=jax.ShapeDtypeStruct((R_total, out_cols), out_dtype),
        grid_spec=pltpu.PrefetchScalarGridSpec(
            num_scalar_prefetch=0,
            grid=(N_pad // tile_n,),
            in_specs=[
                pl.BlockSpec((pack, R_tile), lambda i: (0, i)),
                pl.BlockSpec((pack * D1, 1), lambda i: (0, 0)),
                pl.BlockSpec((pack * D1, 1), lambda i: (0, 0)),
                pl.BlockSpec((pack * D1, out_cols), lambda i: (0, 0)),
            ],
            out_specs=pl.BlockSpec((R_tile, out_cols), lambda i: (i, 0)),
        ),
        compiler_params=pltpu.CompilerParams(
            dimension_semantics=("parallel",),   # shards the grid across TCs on v7x
            vmem_limit_bytes=vmem_limit,
        ),
        cost_estimate=cost,
    )(x_split, w1big, b1big, w2big)

    # Byte-identical row-major unpack back to (N, H); padded tail rows hold
    # tanh(b1)@W2 garbage and are sliced off here (never exposed to callers).
    out = out_flat.reshape(N_pad, H)[:N]
    return out.reshape(*orig_shape, H)


def init_params(key, hid_dim):
    """Deterministic xavier-uniform init matching the PyTorch module shapes."""
    int_dim = int(np.sqrt(hid_dim))
    k1, k2 = jax.random.split(key)
    bound1 = float(np.sqrt(6.0 / (1 + int_dim)))
    bound2 = float(np.sqrt(6.0 / (int_dim + hid_dim)))
    W1 = jax.random.uniform(k1, (1, int_dim), jnp.float32, -bound1, bound1)
    b1 = jnp.zeros((int_dim,), jnp.float32)
    W2 = jax.random.uniform(k2, (int_dim, hid_dim), jnp.float32, -bound2, bound2)
    return W1, b1, W2


def _reference(x, W1, b1, W2):
    return jnp.tanh(x[..., None] * W1[0][None, None, :] + b1[None, None, :]) @ W2


if __name__ == "__main__":
    key = jax.random.PRNGKey(0)
    k_x, k_p, k_x2 = jax.random.split(key, 3)

    hid_dim = 64                          # int_dim = sqrt(64) = 8
    W1, b1, W2 = init_params(k_p, hid_dim)

    # Case 1: small shape consistent with the module (B=2, seq L=8, hidden=64).
    B, L = 2, 8
    x = jax.random.normal(k_x, (B, L), dtype=jnp.float32)
    out = jax.block_until_ready(cve_forward(x, W1, b1, W2))
    ref = _reference(x, W1, b1, W2)
    np.testing.assert_allclose(np.asarray(out), np.asarray(ref), rtol=1e-5, atol=1e-5)
    assert out.shape == (B, L, hid_dim)

    # Case 2: padded, multi-step grid path (N=1200, tile_n=1024 -> N_pad=2048, grid=2).
    B2, L2 = 4, 300
    x2 = jax.random.normal(k_x2, (B2, L2), dtype=jnp.float32)
    out2 = jax.block_until_ready(cve_forward(x2, W1, b1, W2, tile_n=1024))
    ref2 = _reference(x2, W1, b1, W2)
    np.testing.assert_allclose(np.asarray(out2), np.asarray(ref2), rtol=1e-5, atol=1e-5)
    assert out2.shape == (B2, L2, hid_dim)

    # Case 3: bf16 output path (halves HBM writeback), loose tolerance vs f32 ref.
    out3 = jax.block_until_ready(cve_forward(x, W1, b1, W2, out_dtype=jnp.bfloat16))
    np.testing.assert_allclose(np.asarray(out3, dtype=np.float32), np.asarray(ref),
                               rtol=5e-2, atol=5e-2)
    assert out3.dtype == jnp.bfloat16 and out3.shape == (B, L, hid_dim)

    print("KERNEL_OK")
</pallas_src>

<mosaic_0001>
module attributes {stable_mosaic.version = 11 : i64} {
  func.func @cve_kernel(%arg0: i32, %arg1: memref<2x128xf32, #tpu.memory_space<vmem>>, %arg2: memref<16x1xf32, #tpu.memory_space<vmem>>, %arg3: memref<16x1xf32, #tpu.memory_space<vmem>>, %arg4: memref<16x128xf32, #tpu.memory_space<vmem>>, %arg5: memref<128x128xf32, #tpu.memory_space<vmem>>) attributes {dimension_semantics = [#tpu.dimension_semantics<parallel>], iteration_bounds = array<i64: 1>, scalar_prefetch = 0 : i64, scratch_operands = 0 : i64, tpu.core_type = #tpu.core_type<tc>, window_params = [{transform_indices = @transform_0, window_bounds = array<i64: 2, 128>}, {pipeline_mode = #tpu.pipeline_mode<synchronous>, transform_indices = @transform_1, window_bounds = array<i64: 16, 1>}, {pipeline_mode = #tpu.pipeline_mode<synchronous>, transform_indices = @transform_2, window_bounds = array<i64: 16, 1>}, {pipeline_mode = #tpu.pipeline_mode<synchronous>, transform_indices = @transform_3, window_bounds = array<i64: 16, 128>}, {transform_indices = @transform_4, window_bounds = array<i64: 128, 128>}]} {
    %c0 = arith.constant 0 : index
    %c0_0 = arith.constant 0 : index
    %0 = vector.load %arg1[%c0, %c0_0] : memref<2x128xf32, #tpu.memory_space<vmem>>, vector<2x128xf32>
    %1 = vector.extract_strided_slice %0 {offsets = [0, 0], sizes = [1, 128], strides = [1, 1]} : vector<2x128xf32> to vector<1x128xf32>
    %2 = vector.shape_cast %1 : vector<1x128xf32> to vector<1x128xf32>
    %3 = vector.broadcast %2 : vector<1x128xf32> to vector<8x128xf32>
    %4 = vector.extract_strided_slice %0 {offsets = [1, 0], sizes = [1, 128], strides = [1, 1]} : vector<2x128xf32> to vector<1x128xf32>
    %5 = vector.shape_cast %4 : vector<1x128xf32> to vector<1x128xf32>
    %6 = vector.broadcast %5 : vector<1x128xf32> to vector<8x128xf32>
    %7 = tpu.concatenate %3, %6 in 0 : vector<8x128xf32>, vector<8x128xf32> -> vector<16x128xf32>
    %c0_1 = arith.constant 0 : index
    %c0_2 = arith.constant 0 : index
    %8 = vector.load %arg2[%c0_1, %c0_2] : memref<16x1xf32, #tpu.memory_space<vmem>>, vector<16x1xf32>
    %9 = vector.broadcast %8 : vector<16x1xf32> to vector<16x128xf32>
    %10 = arith.mulf %7, %9 : vector<16x128xf32>
    %c0_3 = arith.constant 0 : index
    %c0_4 = arith.constant 0 : index
    %11 = vector.load %arg3[%c0_3, %c0_4] : memref<16x1xf32, #tpu.memory_space<vmem>>, vector<16x1xf32>
    %12 = vector.broadcast %11 : vector<16x1xf32> to vector<16x128xf32>
    %13 = arith.addf %10, %12 : vector<16x128xf32>
    %14 = math.tanh %13 : vector<16x128xf32>
    %15 = tpu.transpose %14, [1, 0] : vector<16x128xf32> -> vector<128x16xf32>
    %c0_5 = arith.constant 0 : index
    %c0_6 = arith.constant 0 : index
    %16 = vector.load %arg4[%c0_5, %c0_6] : memref<16x128xf32, #tpu.memory_space<vmem>>, vector<16x128xf32>
    %cst = arith.constant dense<0.000000e+00> : vector<128x128xf32>
    %17 = tpu.matmul %15, %16, %cst {dimension_numbers = #tpu.dot_dimension_numbers<[1], [0], [0], [1], [0, 0, 1, 1], [], []>} : vector<128x16xf32>, vector<16x128xf32>, vector<128x128xf32> -> vector<128x128xf32>
    %c0_7 = arith.constant 0 : index
    %c0_8 = arith.constant 0 : index
    %18 = vector.load %arg5[%c0_7, %c0_8] : memref<128x128xf32, #tpu.memory_space<vmem>>, vector<128x128xf32>
    tpu.vector_store %arg5[%c0_7, %c0_8], %17 {strides = array<i32>} : memref<128x128xf32, #tpu.memory_space<vmem>>, vector<128x128xf32>,
    return
  }
  func.func @transform_0(%arg0: i32) -> (i32, i32) {
    %c0_i32 = arith.constant 0 : i32
    %c0_i32_0 = arith.constant 0 : i32
    return %c0_i32, %arg0 : i32, i32
  }
  func.func @transform_1(%arg0: i32) -> (i32, i32) {
    %c0_i32 = arith.constant 0 : i32
    %c0_i32_0 = arith.constant 0 : i32
    %c0_i32_1 = arith.constant 0 : i32
    return %c0_i32, %c0_i32_0 : i32, i32
  }
  func.func @transform_2(%arg0: i32) -> (i32, i32) {
    %c0_i32 = arith.constant 0 : i32
    %c0_i32_0 = arith.constant 0 : i32
    %c0_i32_1 = arith.constant 0 : i32
    return %c0_i32, %c0_i32_0 : i32, i32
  }
  func.func @transform_3(%arg0: i32) -> (i32, i32) {
    %c0_i32 = arith.constant 0 : i32
    %c0_i32_0 = arith.constant 0 : i32
    %c0_i32_1 = arith.constant 0 : i32
    return %c0_i32, %c0_i32_0 : i32, i32
  }
  func.func @transform_4(%arg0: i32) -> (i32, i32) {
    %c0_i32 = arith.constant 0 : i32
    %c0_i32_0 = arith.constant 0 : i32
    return %arg0, %c0_i32 : i32, i32
  }
}

</mosaic_0001>

<bundles_post_ra>
// kernel: tpu_custom_call.1
= control target key start
LH: loop header
LB: loop body
LE: loop exit
PB: predicated region body
PF: predicated region fallthrough
CT: control target
= control target key end

     0   :  { %v416_v2 = vmov 0   ;;  %s485_s0 = inlined_call_operand.vmem [shape: f32[2,128], index: 0, kind: input, shape index: {}]   ;;  %s486_s1 = inlined_call_operand.vmem [shape: f32[16,1], index: 1, kind: input, shape index: {}]   ;;  %s487_s2 = inlined_call_operand.vmem [shape: f32[16,1], index: 2, kind: input, shape index: {}]   ;;  %s488_s3 = inlined_call_operand.vmem [shape: f32[16,128], index: 3, kind: input, shape index: {}]   ;;  %s489_s4 = inlined_call_operand.hbm [shape: f32[128,128], index: 4, kind: output, shape index: {}]  }
   0x1   :  { %v41_v0 = vld [vmem:[%s487_s2] sm:$0xff]  ;;  %389 = vset.pattern.permute.xlu1 %v416_v2  ;;  %388 = vset.pattern.permute.xlu0 %v416_v2 }
   0x2   :  { %v27_v1 = vld [vmem:[%s486_s1] sm:$0xff] }
   0x3   :  { %9 = vsyncpa [#allocation3], 0  ;;  %45 = vperm.xlu1 %389, %v41_v0   ;;  %31 = vperm.xlu0 %388, %v27_v1   ;;  %v42_v3 = vld [vmem:[%s487_s2 + $0x8] sm:$0xff]  ;;  %v19_v5 = vlaneseq  ;;  %v18_v8 = vld [vmem:[%s485_s0] sm:$0x3]  ;;  %vm91_vm0 = vcmask 130048  }
   0x4   :  { %v28_v4 = vld [vmem:[%s486_s1 + $0x8] sm:$0xff]  ;;  %v89_v21 = vld [vmem:[%s488_s3] sm:$0xff] }
   0x5   :  { %v20_v6 = vshrl.u32 %v19_v5, 7  ;;  %v90_v20 = vld [vmem:[%s488_s3 + $0x8] sm:$0xff]  ;;  %s417_s3 = smov [#allocation2]  }
   0x6   :  { %351 = vmatprep.subr.mxu0 %v90_v20  ;;  %379 = vmatprep.subr.mxu1 %v90_v20  ;;  %s306_s26 = sshll.u32 %s417_s3, 4  ;;  %s307_s26 = int_to_ptr.vmem [resolvable:$true] %s306_s26 }
   0x7   :  { %50 = vperm.xlu1 %389, %v42_v3   ;;  %36 = vperm.xlu0 %388, %v28_v4   ;;  %v21_v7 = vsub.s32 0, %v20_v6  ;;  %v25_v10 = vsub.s32 1, %v20_v6  ;;  %s394_s27 = scalar_lea.vmem %s307_s26, 2048  ;;  %p399_p1 = scmp.lt.s32.totalorder %s307_s26, %s307_s26 }
   0x8   :  { %352 = vmatpush3.msra.mxu0 %v90_v20  ;;  %381 = vmatpush3.msra.mxu1 %v90_v20  ;;  %p395_p0 = scmp.ne.s32.totalorder %s307_s26, %s394_s27  ;;  %p400_p2 = scmp.lt.s32.totalorder %s394_s27, %s394_s27 }
   0x9   :  { %v22_v9 = vrot.slane %v18_v8, %v21_v7  ;;  %v26_v14 = vrot.slane %v18_v8, %v25_v10  ;;  %353 = vmatprep.subr.mxu0 %v89_v21  ;;  %380 = vmatprep.subr.mxu1 %v89_v21 }
   0xa   :  { %354 = vmatpush3.msra.mxu0 %v89_v21  ;;  %382 = vmatpush3.msra.mxu1 %v89_v21  ;;  %p401_p3 = por %p400_p2, %p399_p1 }
   0xc   :  { %p402_p4 = pnand %p401_p3, %p395_p0 }
  0x7e   :  { %v46_v11 = vpop.permute.xlu1 %45  ;;  %v32_v12 = vpop.permute.xlu0 %31 }
  0x7f   :  { %v39_v13 = vmul.f32 %v32_v12, %v22_v9 }
  0x81   :  { %v53_v15 = vadd.f32 %v46_v11, %v39_v13 }
  0x82   :  { %v37_v16 = vpop.permute.xlu0 %36  ;;  %v51_v18 = vpop.permute.xlu1 %50 }
  0x83   :  { %390 = vtanh.f32 %v53_v15  ;;  %v40_v17 = vmul.f32 %v37_v16, %v26_v14 }
  0x85   :  { %v54_v19 = vadd.f32 %v51_v18, %v40_v17 }
  0x87   :  { %392 = vtanh.f32 %v54_v19 }
  0x90   :  { %v391_v22 = vpop.eup %390 }
  0x91   :  { %57 = vxpose.xlu0.b32.start [1/2] (short) %v391_v22, 128 }
  0x94   :  { %v393_v23 = vpop.eup %392 }
  0x95   :  { %58 = vxpose.xlu0.b32.end [2/2] (short) %v393_v23, 128 }
 0x10d   :  { %v73_v24 = vpop.trf.xlu0 }
 0x10e   :  { %355 = vmatprep.mubr.msk.f32.mxu0 %vm91_vm0, %v73_v24 }
 0x111   :  { %v74_v25 = vpop.trf.xlu0 }
 0x112   :  { %356 = vmatmul.mubr.msk.f32.vlgmr.msra.gmra.mxu0 %vm91_vm0, %v74_v25 }
 0x115   :  { %v75_v26 = vpop.trf.xlu0 }
 0x116   :  { %358 = vmatprep.mubr.msk.f32.mxu0 %vm91_vm0, %v75_v26 }
 0x119   :  { %v76_v27 = vpop.trf.xlu0 }
 0x11a   :  { %359 = vmatmul.mubr.msk.f32.gmra.mxu0 %vm91_vm0, %v76_v27 }
 0x11d   :  { %v77_v28 = vpop.trf.xlu0 }
 0x11e   :  { %361 = vmatprep.mubr.msk.f32.mxu0 %vm91_vm0, %v77_v28 }
 0x121   :  { %v78_v29 = vpop.trf.xlu0 }
 0x122   :  { %362 = vmatmul.mubr.msk.f32.gmra.mxu0 %vm91_vm0, %v78_v29 }
 0x125   :  { %v79_v30 = vpop.trf.xlu0 }
 0x126   :  { %364 = vmatprep.mubr.msk.f32.mxu0 %vm91_vm0, %v79_v30 }
 0x129   :  { %v80_v31 = vpop.trf.xlu0 }
 0x12a   :  { %365 = vmatmul.mubr.msk.f32.gmra.mxu0 %vm91_vm0, %v80_v31 }
 0x12d   :  { %v81_v32 = vpop.trf.xlu0 }
 0x12e   :  { %367 = vmatprep.mubr.msk.f32.mxu1 %vm91_vm0, %v81_v32 }
 0x131   :  { %v82_v33 = vpop.trf.xlu0 }
 0x132   :  { %368 = vmatmul.mubr.msk.f32.vlgmr.msra.gmra.mxu1 %vm91_vm0, %v82_v33 }
 0x135   :  { %v83_v34 = vpop.trf.xlu0 }
 0x136   :  { %370 = vmatprep.mubr.msk.f32.mxu1 %vm91_vm0, %v83_v34 }
 0x139   :  { %v84_v35 = vpop.trf.xlu0 }
 0x13a   :  { %371 = vmatmul.mubr.msk.f32.gmra.mxu1 %vm91_vm0, %v84_v35 }
 0x13d   :  { %v85_v36 = vpop.trf.xlu0 }
 0x13e   :  { %373 = vmatprep.mubr.msk.f32.mxu1 %vm91_vm0, %v85_v36 }
 0x141   :  { %v86_v37 = vpop.trf.xlu0 }
 0x142   :  { %374 = vmatmul.mubr.msk.f32.gmra.mxu1 %vm91_vm0, %v86_v37 }
 0x145   :  { %v87_v38 = vpop.trf.xlu0 }
 0x146   :  { %376 = vmatprep.mubr.msk.f32.mxu1 %vm91_vm0, %v87_v38 }
 0x149   :  { %v88_v39 = vpop.trf.xlu0 }
 0x14a   :  { %377 = vmatmul.mubr.msk.f32.gmra.mxu1 %vm91_vm0, %v88_v39 }
 0x1d2   :  { %v357_v40 = vpop.f32.mrf.mxu0 }
 0x1d3   :  { %286 = vst [vmem:[#allocation2 + $0x8] sm:$0xff] %v357_v40 }
 0x1d4   :  { %v206_v41 = vpop.f32.mrf.mxu0 }
 0x1d5   :  { %285 = vst [vmem:[#allocation2] sm:$0xff] %v206_v41 }
 0x1da   :  { %v360_v42 = vpop.f32.mrf.mxu0 }
 0x1db   :  { %288 = vst [vmem:[#allocation2 + $0x18] sm:$0xff] %v360_v42 }
 0x1dc   :  { %v216_v43 = vpop.f32.mrf.mxu0 }
 0x1dd   :  { %287 = vst [vmem:[#allocation2 + $0x10] sm:$0xff] %v216_v43 }
 0x1e2   :  { %v363_v44 = vpop.f32.mrf.mxu0 }
 0x1e3   :  { %290 = vst [vmem:[#allocation2 + $0x28] sm:$0xff] %v363_v44 }
 0x1e4   :  { %v226_v45 = vpop.f32.mrf.mxu0 }
 0x1e5   :  { %289 = vst [vmem:[#allocation2 + $0x20] sm:$0xff] %v226_v45 }
 0x1ea   :  { %v366_v46 = vpop.f32.mrf.mxu0 }
 0x1eb   :  { %292 = vst [vmem:[#allocation2 + $0x38] sm:$0xff] %v366_v46 }
 0x1ec   :  { %v236_v47 = vpop.f32.mrf.mxu0 }
 0x1ed   :  { %291 = vst [vmem:[#allocation2 + $0x30] sm:$0xff] %v236_v47 }
 0x1f2   :  { %v369_v48 = vpop.f32.mrf.mxu1 }
 0x1f3   :  { %294 = vst [vmem:[#allocation2 + $0x48] sm:$0xff] %v369_v48 }
 0x1f4   :  { %v246_v49 = vpop.f32.mrf.mxu1 }
 0x1f5   :  { %293 = vst [vmem:[#allocation2 + $0x40] sm:$0xff] %v246_v49 }
 0x1fa   :  { %v372_v50 = vpop.f32.mrf.mxu1 }
 0x1fb   :  { %296 = vst [vmem:[#allocation2 + $0x58] sm:$0xff] %v372_v50 }
 0x1fc   :  { %v256_v51 = vpop.f32.mrf.mxu1 }
 0x1fd   :  { %295 = vst [vmem:[#allocation2 + $0x50] sm:$0xff] %v256_v51 }
 0x202   :  { %v375_v52 = vpop.f32.mrf.mxu1 }
 0x203   :  { %298 = vst [vmem:[#allocation2 + $0x68] sm:$0xff] %v375_v52 }
 0x204   :  { %v266_v53 = vpop.f32.mrf.mxu1 }
 0x205   :  { %297 = vst [vmem:[#allocation2 + $0x60] sm:$0xff] %v266_v53 }
 0x20a   :  { %v378_v54 = vpop.f32.mrf.mxu1 }
 0x20b   :  { %300 = vst [vmem:[#allocation2 + $0x78] sm:$0xff] %v378_v54 }
 0x20c   :  { %v276_v55 = vpop.f32.mrf.mxu1 }
 0x20d   :  { %299 = vst [vmem:[#allocation2 + $0x70] sm:$0xff] %v276_v55 }
 0x20e   :  { %405 = shalt.err (!%p402_p4)
}
 0x20f   :  { %s418_s28 = smov 128   ;;  %s419_s29 = smov 8  }
 0x210   :  { %312 = dma.vmem_to_hbm [thread:$0]  %s307_s26, 2048, %s489_s4, [#allocation3], %s418_s28, %s418_s28, %s419_s29  }
 0x211   :  { %414 = dma.done.wait [#allocation3], 2048  }
 0x212   :  { %415 = vsyncadd [#allocation3], 4294965248 }
 0x213   :  { %316 = vsyncpa [#allocation3], 1 }

</bundles_post_ra>
